<compile_context>
chip_gen: v5e
topology: v5e:2x2
jax: 0.10.0
libtpu: 0.0.40
codegen_flags: <defaults>
</compile_context>

<pallas_src>
import functools

import jax
import jax.numpy as jnp
from jax.experimental import pallas as pl
from jax.experimental.pallas import tpu as pltpu

DROPOUT_RATE = 0.3
HIDDEN_LAYER_NODES_1 = 50
HIDDEN_LAYER_NODES_2 = 50
OUTPUT_DIMENSION = 2

_GOLDEN1 = 0x9E3779B9   # seed mixing constants
_GOLDEN2 = 0x85EBCA6B


def _hash_u32(x):
    """splitmix32 / lowbias32-style mixer on uint32 arrays (VPU-only ops)."""
    x = x ^ (x >> 16)
    x = x * jnp.uint32(0x7FEB352D)
    x = x ^ (x >> 15)
    x = x * jnp.uint32(0x846CA68B)
    x = x ^ (x >> 16)
    return x


def _bnn_kernel(seed_ref, x1_ref, x2_ref, w1a_ref, w1b_ref, b1_ref,
                w2_ref, b2_ref, w3_ref, b3_ref, o_ref, *, p):
    """Fused 3-layer MLP with MC-dropout (train-mode nn.Dropout semantics)."""
    pid = pl.program_id(0)
    seed_u32 = seed_ref[0].astype(jnp.uint32)
    # Integer threshold: drop element iff hash_bits < p * 2^32.
    thresh = jnp.uint32(int(p * 4294967296.0) & 0xFFFFFFFF)

    def dropout(h, salt):
        if p <= 0.0:                         # static (trace-time) skip
            return h
        r, c = h.shape
        row = jax.lax.broadcasted_iota(jnp.int32, (r, c), 0)
        col = jax.lax.broadcasted_iota(jnp.int32, (r, c), 1)
        # Globally-unique element counter: different per tile, row, col.
        idx = ((pid * r + row) * c + col).astype(jnp.uint32)
        key = (seed_u32 * jnp.uint32(_GOLDEN1)
               + jnp.uint32(salt) * jnp.uint32(_GOLDEN2))
        bits = _hash_u32(idx + key)
        keep = bits >= thresh
        # Survivor scaling 1/(1-p) is pre-folded into W2/W3 (prepare_params),
        # so dropout here is a pure mask-select (saves one vmul/elem on VPU).
        return jnp.where(keep, h, 0.0)

    # Layer 1: W1 is split row-wise so no wrapper-side concat of x1/x2 is needed.
    h1 = (jnp.dot(x1_ref[...], w1a_ref[...], preferred_element_type=jnp.float32)
          + jnp.dot(x2_ref[...], w1b_ref[...], preferred_element_type=jnp.float32)
          + b1_ref[...])
    h1 = jnp.maximum(h1, 0.0)
    h1 = dropout(h1, salt=1)

    h2 = jnp.dot(h1, w2_ref[...], preferred_element_type=jnp.float32) + b2_ref[...]
    h2 = jnp.maximum(h2, 0.0)
    h2 = dropout(h2, salt=2)

    o_ref[...] = (jnp.dot(h2, w3_ref[...], preferred_element_type=jnp.float32)
                  + b3_ref[...]).astype(o_ref.dtype)


def prepare_params(params, d1, *, p=DROPOUT_RATE):
    """One-time parameter transform (do NOT call per forward pass):
       - split W1 row-wise for the two input chunks (x1 width = d1),
       - fold the dropout survivor scaling 1/(1-p) into W2 and W3."""
    w1, b1, w2, b2, w3, b3 = params
    scale = 1.0 if p <= 0.0 else 1.0 / (1.0 - p)
    return (w1[:d1], w1[d1:], b1, w2 * scale, b2, w3 * scale, b3)


def bnn_forward(x1, x2, prep_params, seed, *, p=DROPOUT_RATE, block_b=512):
    """x1, x2: the two (B, d_i) feature chunks (== torch.cat(x, dim=1) input)."""
    x1 = x1.astype(jnp.float32)
    x2 = x2.astype(jnp.float32)
    b = x1.shape[0]
    d1, d2 = x1.shape[1], x2.shape[1]
    w1a, w1b, b1, w2, b2, w3, b3 = prep_params

    # Batch tile: full batch if small, else 512-row blocks (double-buffered DMA).
    # ~512x(32+50+50+2) f32 per tile << 32 MiB scoped VMEM, safe on v7x's 64 MiB.
    bb = b if b <= block_b else block_b
    grid = (pl.cdiv(b, bb),)

    seed_arr = jnp.asarray([seed], dtype=jnp.int32)
    const = lambda i, s: (0, 0)          # weights/biases stay VMEM-resident

    grid_spec = pltpu.PrefetchScalarGridSpec(
        num_scalar_prefetch=1,
        grid=grid,
        in_specs=[
            pl.BlockSpec((bb, d1), lambda i, s: (i, 0)),
            pl.BlockSpec((bb, d2), lambda i, s: (i, 0)),
            pl.BlockSpec(w1a.shape, const),
            pl.BlockSpec(w1b.shape, const),
            pl.BlockSpec(b1.shape, const),
            pl.BlockSpec(w2.shape, const),
            pl.BlockSpec(b2.shape, const),
            pl.BlockSpec(w3.shape, const),
            pl.BlockSpec(b3.shape, const),
        ],
        out_specs=pl.BlockSpec((bb, OUTPUT_DIMENSION), lambda i, s: (i, 0)),
    )

    return pl.pallas_call(
        functools.partial(_bnn_kernel, p=p),
        out_shape=jax.ShapeDtypeStruct((b, OUTPUT_DIMENSION), jnp.float32),
        grid_spec=grid_spec,
        compiler_params=pltpu.CompilerParams(
            dimension_semantics=("parallel",),     # megacore sharding on v7x
            vmem_limit_bytes=64 * 1024 * 1024,
        ),
    )(seed_arr, x1, x2, w1a, w1b, b1, w2, b2, w3, b3)


def init_params(key, input_dim):
    """Deterministic init mimicking nn.Linear's U(-1/sqrt(fan_in), +)."""
    ks = jax.random.split(key, 6)

    def linear(kw, kb, fan_in, fan_out):
        bound = 1.0 / jnp.sqrt(fan_in)
        w = jax.random.uniform(kw, (fan_in, fan_out), jnp.float32, -bound, bound)
        bias = jax.random.uniform(kb, (1, fan_out), jnp.float32, -bound, bound)
        return w, bias

    w1, b1 = linear(ks[0], ks[1], input_dim, HIDDEN_LAYER_NODES_1)
    w2, b2 = linear(ks[2], ks[3], HIDDEN_LAYER_NODES_1, HIDDEN_LAYER_NODES_2)
    w3, b3 = linear(ks[4], ks[5], HIDDEN_LAYER_NODES_2, OUTPUT_DIMENSION)
    return (w1, b1, w2, b2, w3, b3)


def _reference_no_dropout(x1, x2, prep):
    w1a, w1b, b1, w2, b2, w3, b3 = prep
    h1 = jnp.maximum(x1 @ w1a + x2 @ w1b + b1, 0.0)
    h2 = jnp.maximum(h1 @ w2 + b2, 0.0)
    return h2 @ w3 + b3


if __name__ == "__main__":
    key = jax.random.PRNGKey(0)
    k_params, k_x1, k_x2 = jax.random.split(key, 3)

    # forward() takes a sequence of tensors concatenated on dim=1:
    # two feature chunks of width 16 each -> input_dim = 32, batch = 8.
    batch = 8
    x1 = jax.random.normal(k_x1, (batch, 16), jnp.float32)
    x2 = jax.random.normal(k_x2, (batch, 16), jnp.float32)
    input_dim = x1.shape[1] + x2.shape[1]

    params = init_params(k_params, input_dim)

    # Deterministic sanity check (p=0 disables dropout -> compare against jnp).
    prep0 = prepare_params(params, d1=x1.shape[1], p=0.0)
    out0 = jax.block_until_ready(bnn_forward(x1, x2, prep0, seed=0, p=0.0))
    ref0 = _reference_no_dropout(x1, x2, prep0)
    assert out0.shape == (batch, OUTPUT_DIMENSION)
    assert jnp.allclose(out0, ref0, rtol=5e-2, atol=5e-2)

    # MC-dropout forward (train-mode Dropout semantics, p = 0.3).
    prep = prepare_params(params, d1=x1.shape[1], p=DROPOUT_RATE)
    out = jax.block_until_ready(bnn_forward(x1, x2, prep, seed=1234,
                                            p=DROPOUT_RATE))
    assert out.shape == (batch, OUTPUT_DIMENSION)
    assert out.dtype == jnp.float32
    assert bool(jnp.isfinite(out).all())
    print("KERNEL_OK")
</pallas_src>

<mosaic_0001>
module attributes {stable_mosaic.version = 11 : i64} {
  func.func @_bnn_kernel(%arg0: i32, %arg1: memref<1xi32, #tpu.memory_space<smem>>, %arg2: memref<8x16xf32, #tpu.memory_space<vmem>>, %arg3: memref<8x16xf32, #tpu.memory_space<vmem>>, %arg4: memref<16x50xf32, #tpu.memory_space<vmem>>, %arg5: memref<16x50xf32, #tpu.memory_space<vmem>>, %arg6: memref<1x50xf32, #tpu.memory_space<vmem>>, %arg7: memref<50x50xf32, #tpu.memory_space<vmem>>, %arg8: memref<1x50xf32, #tpu.memory_space<vmem>>, %arg9: memref<50x2xf32, #tpu.memory_space<vmem>>, %arg10: memref<1x2xf32, #tpu.memory_space<vmem>>, %arg11: memref<8x2xf32, #tpu.memory_space<vmem>>) attributes {dimension_semantics = [#tpu.dimension_semantics<parallel>], iteration_bounds = array<i64: 1>, scalar_prefetch = 1 : i64, scratch_operands = 0 : i64, tpu.core_type = #tpu.core_type<tc>, window_params = [{transform_indices = @transform_0, window_bounds = array<i64: 8, 16>}, {transform_indices = @transform_1, window_bounds = array<i64: 8, 16>}, {pipeline_mode = #tpu.pipeline_mode<synchronous>, transform_indices = @transform_2, window_bounds = array<i64: 16, 50>}, {pipeline_mode = #tpu.pipeline_mode<synchronous>, transform_indices = @transform_3, window_bounds = array<i64: 16, 50>}, {pipeline_mode = #tpu.pipeline_mode<synchronous>, transform_indices = @transform_4, window_bounds = array<i64: 1, 50>}, {pipeline_mode = #tpu.pipeline_mode<synchronous>, transform_indices = @transform_5, window_bounds = array<i64: 50, 50>}, {pipeline_mode = #tpu.pipeline_mode<synchronous>, transform_indices = @transform_6, window_bounds = array<i64: 1, 50>}, {pipeline_mode = #tpu.pipeline_mode<synchronous>, transform_indices = @transform_7, window_bounds = array<i64: 50, 2>}, {pipeline_mode = #tpu.pipeline_mode<synchronous>, transform_indices = @transform_8, window_bounds = array<i64: 1, 2>}, {transform_indices = @transform_9, window_bounds = array<i64: 8, 2>}]} {
    %c0 = arith.constant 0 : index
    %c0_0 = arith.constant 0 : index
    %0 = vector.load %arg2[%c0, %c0_0] : memref<8x16xf32, #tpu.memory_space<vmem>>, vector<8x16xf32>
    %c0_1 = arith.constant 0 : index
    %c0_2 = arith.constant 0 : index
    %1 = vector.load %arg4[%c0_1, %c0_2] : memref<16x50xf32, #tpu.memory_space<vmem>>, vector<16x50xf32>
    %cst = arith.constant dense<0.000000e+00> : vector<8x50xf32>
    %2 = tpu.matmul %0, %1, %cst {dimension_numbers = #tpu.dot_dimension_numbers<[1], [0], [0], [1], [0, 0, 1, 1], [], []>} : vector<8x16xf32>, vector<16x50xf32>, vector<8x50xf32> -> vector<8x50xf32>
    %c0_3 = arith.constant 0 : index
    %c0_4 = arith.constant 0 : index
    %3 = vector.load %arg3[%c0_3, %c0_4] : memref<8x16xf32, #tpu.memory_space<vmem>>, vector<8x16xf32>
    %c0_5 = arith.constant 0 : index
    %c0_6 = arith.constant 0 : index
    %4 = vector.load %arg5[%c0_5, %c0_6] : memref<16x50xf32, #tpu.memory_space<vmem>>, vector<16x50xf32>
    %cst_7 = arith.constant dense<0.000000e+00> : vector<8x50xf32>
    %5 = tpu.matmul %3, %4, %cst_7 {dimension_numbers = #tpu.dot_dimension_numbers<[1], [0], [0], [1], [0, 0, 1, 1], [], []>} : vector<8x16xf32>, vector<16x50xf32>, vector<8x50xf32> -> vector<8x50xf32>
    %6 = arith.addf %2, %5 : vector<8x50xf32>
    %c0_8 = arith.constant 0 : index
    %c0_9 = arith.constant 0 : index
    %7 = vector.load %arg6[%c0_8, %c0_9] : memref<1x50xf32, #tpu.memory_space<vmem>>, vector<1x50xf32>
    %8 = vector.broadcast %7 : vector<1x50xf32> to vector<8x50xf32>
    %9 = arith.addf %6, %8 : vector<8x50xf32>
    %cst_10 = arith.constant 0.000000e+00 : f32
    %10 = vector.broadcast %cst_10 : f32 to vector<8x50xf32>
    %11 = arith.maximumf %9, %10 : vector<8x50xf32>
    %c0_11 = arith.constant 0 : index
    %c0_12 = arith.constant 0 : index
    %12 = vector.load %arg7[%c0_11, %c0_12] : memref<50x50xf32, #tpu.memory_space<vmem>>, vector<50x50xf32>
    %cst_13 = arith.constant dense<0.000000e+00> : vector<8x50xf32>
    %13 = tpu.matmul %11, %12, %cst_13 {dimension_numbers = #tpu.dot_dimension_numbers<[1], [0], [0], [1], [0, 0, 1, 1], [], []>} : vector<8x50xf32>, vector<50x50xf32>, vector<8x50xf32> -> vector<8x50xf32>
    %c0_14 = arith.constant 0 : index
    %c0_15 = arith.constant 0 : index
    %14 = vector.load %arg8[%c0_14, %c0_15] : memref<1x50xf32, #tpu.memory_space<vmem>>, vector<1x50xf32>
    %15 = vector.broadcast %14 : vector<1x50xf32> to vector<8x50xf32>
    %16 = arith.addf %13, %15 : vector<8x50xf32>
    %cst_16 = arith.constant 0.000000e+00 : f32
    %17 = vector.broadcast %cst_16 : f32 to vector<8x50xf32>
    %18 = arith.maximumf %16, %17 : vector<8x50xf32>
    %c0_17 = arith.constant 0 : index
    %c0_18 = arith.constant 0 : index
    %19 = vector.load %arg9[%c0_17, %c0_18] : memref<50x2xf32, #tpu.memory_space<vmem>>, vector<50x2xf32>
    %cst_19 = arith.constant dense<0.000000e+00> : vector<8x2xf32>
    %20 = tpu.matmul %18, %19, %cst_19 {dimension_numbers = #tpu.dot_dimension_numbers<[1], [0], [0], [1], [0, 0, 1, 1], [], []>} : vector<8x50xf32>, vector<50x2xf32>, vector<8x2xf32> -> vector<8x2xf32>
    %c0_20 = arith.constant 0 : index
    %c0_21 = arith.constant 0 : index
    %21 = vector.load %arg10[%c0_20, %c0_21] : memref<1x2xf32, #tpu.memory_space<vmem>>, vector<1x2xf32>
    %22 = vector.broadcast %21 : vector<1x2xf32> to vector<8x2xf32>
    %23 = arith.addf %20, %22 : vector<8x2xf32>
    %c0_22 = arith.constant 0 : index
    %c0_23 = arith.constant 0 : index
    %24 = vector.load %arg11[%c0_22, %c0_23] : memref<8x2xf32, #tpu.memory_space<vmem>>, vector<8x2xf32>
    tpu.vector_store %arg11[%c0_22, %c0_23], %23 {strides = array<i32>} : memref<8x2xf32, #tpu.memory_space<vmem>>, vector<8x2xf32>,
    return
  }
  func.func @transform_0(%arg0: i32, %arg1: memref<1xi32, #tpu.memory_space<smem>>) -> (i32, i32) {
    %c0_i32 = arith.constant 0 : i32
    %c0_i32_0 = arith.constant 0 : i32
    return %arg0, %c0_i32 : i32, i32
  }
  func.func @transform_1(%arg0: i32, %arg1: memref<1xi32, #tpu.memory_space<smem>>) -> (i32, i32) {
    %c0_i32 = arith.constant 0 : i32
    %c0_i32_0 = arith.constant 0 : i32
    return %arg0, %c0_i32 : i32, i32
  }
  func.func @transform_2(%arg0: i32, %arg1: memref<1xi32, #tpu.memory_space<smem>>) -> (i32, i32) {
    %c0_i32 = arith.constant 0 : i32
    %c0_i32_0 = arith.constant 0 : i32
    %c0_i32_1 = arith.constant 0 : i32
    return %c0_i32, %c0_i32_0 : i32, i32
  }
  func.func @transform_3(%arg0: i32, %arg1: memref<1xi32, #tpu.memory_space<smem>>) -> (i32, i32) {
    %c0_i32 = arith.constant 0 : i32
    %c0_i32_0 = arith.constant 0 : i32
    %c0_i32_1 = arith.constant 0 : i32
    return %c0_i32, %c0_i32_0 : i32, i32
  }
  func.func @transform_4(%arg0: i32, %arg1: memref<1xi32, #tpu.memory_space<smem>>) -> (i32, i32) {
    %c0_i32 = arith.constant 0 : i32
    %c0_i32_0 = arith.constant 0 : i32
    %c0_i32_1 = arith.constant 0 : i32
    return %c0_i32, %c0_i32_0 : i32, i32
  }
  func.func @transform_5(%arg0: i32, %arg1: memref<1xi32, #tpu.memory_space<smem>>) -> (i32, i32) {
    %c0_i32 = arith.constant 0 : i32
    %c0_i32_0 = arith.constant 0 : i32
    %c0_i32_1 = arith.constant 0 : i32
    return %c0_i32, %c0_i32_0 : i32, i32
  }
  func.func @transform_6(%arg0: i32, %arg1: memref<1xi32, #tpu.memory_space<smem>>) -> (i32, i32) {
    %c0_i32 = arith.constant 0 : i32
    %c0_i32_0 = arith.constant 0 : i32
    %c0_i32_1 = arith.constant 0 : i32
    return %c0_i32, %c0_i32_0 : i32, i32
  }
  func.func @transform_7(%arg0: i32, %arg1: memref<1xi32, #tpu.memory_space<smem>>) -> (i32, i32) {
    %c0_i32 = arith.constant 0 : i32
    %c0_i32_0 = arith.constant 0 : i32
    %c0_i32_1 = arith.constant 0 : i32
    return %c0_i32, %c0_i32_0 : i32, i32
  }
  func.func @transform_8(%arg0: i32, %arg1: memref<1xi32, #tpu.memory_space<smem>>) -> (i32, i32) {
    %c0_i32 = arith.constant 0 : i32
    %c0_i32_0 = arith.constant 0 : i32
    %c0_i32_1 = arith.constant 0 : i32
    return %c0_i32, %c0_i32_0 : i32, i32
  }
  func.func @transform_9(%arg0: i32, %arg1: memref<1xi32, #tpu.memory_space<smem>>) -> (i32, i32) {
    %c0_i32 = arith.constant 0 : i32
    %c0_i32_0 = arith.constant 0 : i32
    return %arg0, %c0_i32 : i32, i32
  }
}

</mosaic_0001>

<bundles_post_ra>
// kernel: tpu_custom_call.1
= control target key start
LH: loop header
LB: loop body
LE: loop exit
PB: predicated region body
PF: predicated region fallthrough
CT: control target
= control target key end

     0   :  { %16 = vsyncpa [#allocation5], 0  ;;  %s484_s0 = inlined_call_operand.<no memory space> [shape: s32[1], index: 0, kind: input, shape index: {}]   ;;  %s485_s1 = inlined_call_operand.hbm [shape: f32[8,16], index: 1, kind: input, shape index: {}]   ;;  %s486_s2 = inlined_call_operand.hbm [shape: f32[8,16], index: 2, kind: input, shape index: {}]   ;;  %s487_s3 = inlined_call_operand.hbm [shape: f32[16,50], index: 3, kind: input, shape index: {}]   ;;  %s488_s4 = inlined_call_operand.hbm [shape: f32[16,50], index: 4, kind: input, shape index: {}]   ;;  %s489_s5 = inlined_call_operand.vmem [shape: f32[1,50], index: 5, kind: input, shape index: {}]   ;;  %s490_s6 = inlined_call_operand.vmem [shape: f32[50,50], index: 6, kind: input, shape index: {}]   ;;  %s491_s7 = inlined_call_operand.vmem [shape: f32[1,50], index: 7, kind: input, shape index: {}]   ;;  %s492_s8 = inlined_call_operand.vmem [shape: f32[50,2], index: 8, kind: input, shape index: {}]   ;;  %s493_s9 = inlined_call_operand.vmem [shape: f32[1,2], index: 9, kind: input, shape index: {}]   ;;  %s494_s10 = inlined_call_operand.vmem [shape: f32[8,2], index: 10, kind: output, shape index: {}]  }
   0x1   :  { %17 = vsyncpa [#allocation7], 0  ;;  %s35_s14 = sshll.u32 %s486_s2, 4  ;;  %s36_s14 = int_to_ptr.hbm [resolvable:$true] %s35_s14 }
   0x2   :  { %18 = vsyncpa [#allocation10], 0  ;;  %s355_s15 = smov [#allocation6]   ;;  %s24_s19 = sshll.u32 %s485_s1, 4  ;;  %s25_s19 = int_to_ptr.hbm [resolvable:$true] %s24_s19 }
   0x3   :  { %s37_s16 = sshll.u32 %s355_s15, 4  ;;  %s356_s20 = smov [#allocation4]   ;;  %s38_s16 = int_to_ptr.vmem [resolvable:$true] %s37_s16 }
   0x4   :  { %40 = dma.hbm_to_vmem [thread:$0]  %s36_s14, 128, %s38_s16, [#allocation7]  }
   0x5   :  { %s26_s21 = sshll.u32 %s356_s20, 4  ;;  %s45_s24 = sshll.u32 %s487_s3, 4  ;;  %s27_s21 = int_to_ptr.vmem [resolvable:$true] %s26_s21  ;;  %s46_s24 = int_to_ptr.hbm [resolvable:$true] %s45_s24 }
   0x6   :  { %29 = dma.hbm_to_vmem [thread:$0]  %s25_s19, 128, %s27_s21, [#allocation5]  }
   0x7   :  { %s357_s2 = smov [#allocation8]   ;;  %s58_s27 = sshll.u32 %s488_s4, 4  ;;  %s59_s27 = int_to_ptr.hbm [resolvable:$true] %s58_s27 }
   0x8   :  { %s47_s25 = sshll.u32 %s357_s2, 4  ;;  %s358_s28 = smov 128   ;;  %s48_s25 = int_to_ptr.vmem [resolvable:$true] %s47_s25 }
   0x9   :  { %s359_s1 = smov 8   ;;  %s360_s29 = smov [#allocation9]  }
   0xa   :  { %53 = dma.hbm_to_vmem [thread:$0]  %s46_s24, 256, %s48_s25, [#allocation7], %s358_s28, %s358_s28, %s359_s1  }
   0xb   :  { %s60_s30 = sshll.u32 %s360_s29, 4  ;;  %s61_s30 = int_to_ptr.vmem [resolvable:$true] %s60_s30 }
   0xc   :  { %66 = dma.hbm_to_vmem [thread:$0]  %s59_s27, 256, %s61_s30, [#allocation10], %s358_s28, %s358_s28, %s359_s1  }
   0xd   :  { %349 = dma.done.wait [#allocation5], 128  }
   0xe   :  { %350 = vsyncadd [#allocation5], 4294967168 }
   0xf   :  { %351 = dma.done.wait [#allocation7], 384  }
  0x10   :  { %352 = vsyncadd [#allocation7], 4294966912 }
  0x11   :  { %353 = dma.done.wait [#allocation10], 256  }
  0x12   :  { %354 = vsyncadd [#allocation10], 4294967040  ;;  %v98_v0 = vld [vmem:[#allocation9 + $0x8] sm:$0xff]  ;;  %v95_v1 = vld [vmem:[#allocation8 + $0x8] sm:$0xff]  ;;  %vm99_vm0 = vcmask 130048   ;;  %vm167_vm1 = vcmask 1041408  }
  0x13   :  { %v97_v2 = vld [vmem:[#allocation9] sm:$0xff]  ;;  %117 = vmatpush.msra.mxu0 %v98_v0  ;;  %140 = vmatpush.msra.mxu1 %v95_v1  ;;  %v94_v3 = vld [vmem:[#allocation8] sm:$0xff]  ;;  %v96_v4 = vld [vmem:[#allocation6] sm:$0xff]  ;;  %vm163_vm2 = vcmask 408576   ;;  %vm229_vm3 = vcmask 15360  }
  0x14   :  { %v93_v5 = vld [vmem:[#allocation4] sm:$0xff]  ;;  %v158_v6 = vld [vmem:[%s490_s6 + $0x30] sm:$0x3]  ;;  %v157_v7 = vld [vmem:[%s490_s6 + $0x28] sm:$0xff] }
  0x15   :  { %118 = vmatpush.msra.mxu0 %v97_v2  ;;  %141 = vmatpush.msra.mxu1 %v94_v3  ;;  %v156_v8 = vld [vmem:[%s490_s6 + $0x20] sm:$0xff]  ;;  %v155_v9 = vld [vmem:[%s490_s6 + $0x18] sm:$0xff]  ;;  %v154_v10 = vld [vmem:[%s490_s6 + $0x10] sm:$0xff] }
  0x16   :  { %238 = vmatmul.msk.f32.vlgmr.msra.gmra.mxu0 %vm99_vm0, %v96_v4  ;;  %239 = vmatmul.msk.f32.vlgmr.msra.gmra.mxu1 %vm99_vm0, %v93_v5  ;;  %v153_v11 = vld [vmem:[%s490_s6 + $0x8] sm:$0xff]  ;;  %v152_v12 = vld [vmem:[%s490_s6] sm:$0xff]  ;;  %v198_v13 = vld [vmem:[%s492_s8 + $0x30] sm:$0x3] }
  0x17   :  { %240 = vmatpush.msk.msra.mxu2 %vm167_vm1, %v158_v6  ;;  %v197_v14 = vld [vmem:[%s492_s8 + $0x28] sm:$0xff]  ;;  %242 = vmatpush.msk.msra.mxu3 %vm167_vm1, %v198_v13  ;;  %v196_v15 = vld [vmem:[%s492_s8 + $0x20] sm:$0xff]  ;;  %v195_v16 = vld [vmem:[%s492_s8 + $0x18] sm:$0xff] }
  0x18   :  { %v250_v17 = vld [vmem:[%s489_s5] ss:$0 sm:$0xff]  ;;  %v194_v23 = vld [vmem:[%s492_s8 + $0x10] sm:$0xff]  ;;  %v193_v24 = vld [vmem:[%s492_s8 + $0x8] sm:$0xff] }
  0x19   :  { %181 = vmatpush.msra.mxu2 %v157_v7  ;;  %219 = vmatpush.msra.mxu3 %v197_v14  ;;  %v192_v25 = vld [vmem:[%s492_s8] sm:$0xff] }
  0x1a   :  { %v251_v26 = vld [vmem:[%s491_s7] ss:$0 sm:$0xff] }
  0x1b   :  { %182 = vmatpush.msra.mxu2 %v156_v8  ;;  %220 = vmatpush.msra.mxu3 %v196_v15  ;;  %v252_v30 = vld [vmem:[%s493_s9] ss:$0 sm:$0xff] }
  0x1d   :  { %183 = vmatpush.msra.mxu2 %v155_v9  ;;  %221 = vmatpush.msra.mxu3 %v195_v16 }
  0x1f   :  { %184 = vmatpush.msra.mxu2 %v154_v10  ;;  %222 = vmatpush.msra.mxu3 %v194_v23 }
  0x21   :  { %185 = vmatpush.msra.mxu2 %v153_v11  ;;  %223 = vmatpush.msra.mxu3 %v193_v24 }
  0x23   :  { %186 = vmatpush.msra.mxu2 %v152_v12  ;;  %224 = vmatpush.msra.mxu3 %v192_v25 }
  0x93   :  { %v120_v18 = vpop.f32.mrf.mxu0  ;;  %v143_v19 = vpop.f32.mrf.mxu1 }
  0x94   :  { %v144_v20 = vadd.f32 %v143_v19, %v120_v18 }
  0x96   :  { %v150_v21 = vadd.f32 %v250_v17, %v144_v20 }
  0x98   :  { %v151_v22 = vmax.f32 %v150_v21, 0.0 }
  0x9a   :  { %241 = vmatmul.msk.f32.vlgmr.msra.gmra.mxu2 %vm163_vm2, %v151_v22 }
 0x11d   :  { %v188_v27 = vpop.f32.mrf.mxu2 }
 0x11e   :  { %v189_v28 = vadd.f32 %v251_v26, %v188_v27 }
 0x120   :  { %v191_v29 = vmax.f32 %v189_v28, 0.0 }
 0x122   :  { %243 = vmatmul.msk.f32.vlgmr.msra.gmra.mxu3 %vm163_vm2, %v191_v29 }
 0x1a5   :  { %v226_v31 = vpop.f32.mrf.mxu3 }
 0x1a6   :  { %v227_v32 = vadd.f32 %v252_v30, %v226_v31 }
 0x1a8   :  { %230 = vst.msk [vmem:[%s494_s10] sm:$0xff] %vm229_vm3, %v227_v32 }
 0x1a9   :  { %235 = vsyncpa [#allocation5], 1 }
 0x1aa   :  { %236 = vsyncpa [#allocation7], 1 }
 0x1ab   :  { %237 = vsyncpa [#allocation10], 1 }

</bundles_post_ra>
